<compile_context>
chip_gen: v5e
topology: v5e:2x2
jax: 0.10.0
libtpu: 0.0.40
codegen_flags: <defaults>
</compile_context>

<pallas_src>
import functools

import jax
import jax.numpy as jnp
from jax.experimental import pallas as pl
from jax.experimental.pallas import tpu as pltpu


def _round_up(x, m):
    return ((x + m - 1) // m) * m


def _vmem_limit_bytes():
    """Generation-aware VMEM budget (~70% of physical: 128 MiB v5e/v6e, 64 MiB v7x)."""
    try:
        cap = pltpu.get_tpu_info().vmem_capacity_bytes
    except Exception:  # fallback if the query is unavailable (e.g. interpret mode)
        cap = 64 * 1024 * 1024
    return int(cap * 0.7)


# ---------------------------------------------------------------------------
# Kernels
# ---------------------------------------------------------------------------

def _pred_kernel(h_ref, ent_ref, pred_ref):
    """pred_score tile = sigmoid(h @ ent_tile^T).

    Grid = (row tiles, entity tiles), entity innermost.  h's block index is
    (mi, 0): constant across the entity axis, so Pallas fetches it once per row
    tile and the kernel body only reads it (no per-step recompute)."""
    logits = jax.lax.dot_general(
        h_ref[...], ent_ref[...],
        dimension_numbers=(((1,), (1,)), ((), ())),
        preferred_element_type=jnp.float32,
    )                                                       # (TM, TN) f32
    # sigmoid(x) = 0.5*tanh(0.5*x) + 0.5  -> single EUP transcendental per element
    # (cheaper epilogue than exp + divide over the full tile).
    pred_ref[...] = (0.5 * jnp.tanh(0.5 * logits) + 0.5).astype(pred_ref.dtype)


def _rule_kernel(h_ref, e2_ref, rule_ref):
    """rule_score = sigmoid(sum(h * e2, -1)).

    Decoupled from the pred kernel (it never touches the entity table), which
    lets the pred kernel's entity axis be marked "parallel" for megacore."""
    prod = h_ref[...].astype(jnp.float32) * e2_ref[...].astype(jnp.float32)  # (TM, D)
    ones = jnp.ones((1, prod.shape[-1]), jnp.bfloat16)
    # Row-sum expressed as a (1,D) x (TM,D)^T matmul with bf16 operands / f32
    # accumulate: stays on the fast single-pass MXU path and the result comes out
    # lane-dense (1, TM) directly (no sublane->lane relayout, no masked 1-wide store).
    logit = jax.lax.dot_general(
        ones, prod.astype(jnp.bfloat16),
        dimension_numbers=(((1,), (1,)), ((), ())),
        preferred_element_type=jnp.float32,
    )                                                       # (1, TM) f32
    rule_ref[...] = 0.5 * jnp.tanh(0.5 * logit) + 0.5


# ---------------------------------------------------------------------------
# pallas_call wrappers
# ---------------------------------------------------------------------------

def _pred_scores_call(h_bf, ent_bf, *, tile_m, tile_n, pred_dtype):
    m_pad, dim_pad = h_bf.shape
    n_ent_pad = ent_bf.shape[0]
    m_tiles = m_pad // tile_m
    n_tiles = n_ent_pad // tile_n

    grid_spec = pltpu.PrefetchScalarGridSpec(
        num_scalar_prefetch=0,
        grid=(m_tiles, n_tiles),                                 # entity axis innermost
        in_specs=[
            pl.BlockSpec((tile_m, dim_pad), lambda mi, nj: (mi, 0)),  # h rows (fetched
                                                                      # once per row tile)
            # Entity tile.  When n_tiles == 1 (resident-table path) this block index
            # is constant -> the table leaves HBM exactly once for the whole call.
            # TODO(synk): add pipeline_mode=pl.Buffered(3) here if profiling shows the
            # entity-tile DMA exposed (small D / short per-tile compute).
            pl.BlockSpec((tile_n, dim_pad), lambda mi, nj: (nj, 0)),
        ],
        out_specs=pl.BlockSpec((tile_m, tile_n), lambda mi, nj: (mi, nj)),
    )
    return pl.pallas_call(
        _pred_kernel,
        grid_spec=grid_spec,
        out_shape=jax.ShapeDtypeStruct((m_pad, n_ent_pad), pred_dtype),
        compiler_params=pltpu.CompilerParams(
            # rule_score lives in its own kernel, so no output block is resident
            # across the entity axis -> both axes are independent -> both "parallel"
            # (v7x megacore can split the large entity axis for small batches).
            dimension_semantics=("parallel", "parallel"),
            vmem_limit_bytes=_vmem_limit_bytes(),
        ),
    )(h_bf, ent_bf)


def _rule_scores_call(h_bf, e2_bf, *, tile_m):
    m_pad, dim_pad = h_bf.shape
    m_tiles = m_pad // tile_m

    grid_spec = pltpu.PrefetchScalarGridSpec(
        num_scalar_prefetch=0,
        grid=(m_tiles,),
        in_specs=[
            pl.BlockSpec((tile_m, dim_pad), lambda mi: (mi, 0)),
            pl.BlockSpec((tile_m, dim_pad), lambda mi: (mi, 0)),
        ],
        # Lane-dense output: (1, tile_m) blocks of a (1, m_pad) array.
        out_specs=pl.BlockSpec((1, tile_m), lambda mi: (0, mi)),
    )
    out = pl.pallas_call(
        _rule_kernel,
        grid_spec=grid_spec,
        out_shape=jax.ShapeDtypeStruct((1, m_pad), jnp.float32),
        compiler_params=pltpu.CompilerParams(
            dimension_semantics=("parallel",),
            vmem_limit_bytes=_vmem_limit_bytes(),
        ),
    )(h_bf, e2_bf)
    return out.reshape(-1)


@functools.partial(jax.jit, static_argnames=("tile_m", "tile_n", "pred_dtype"))
def _predict_padded(e1_p, e2_p, r_p, ent_bf, rel_bf, *, tile_m, tile_n, pred_dtype):
    """predict() over the whole padded example list."""
    # format_batch: embedding lookups (glue; XLA fuses gather + multiply + cast).
    # TODO(synk): fold these gathers into the kernel via scalar-prefetched row ids
    # (PrefetchScalarGridSpec + pl.Element) to skip the HBM intermediates.
    e1_rows = ent_bf[e1_p]           # (m_pad, dim_pad) bf16
    e2_rows = ent_bf[e2_p]
    r_rows = rel_bf[r_p]
    # h = e1 * r computed exactly once per row (f32 multiply, single bf16 downcast);
    # the kernels only ever *read* h, so nothing is recomputed per entity tile.
    h_bf = (e1_rows.astype(jnp.float32) * r_rows.astype(jnp.float32)).astype(jnp.bfloat16)

    pred = _pred_scores_call(h_bf, ent_bf, tile_m=tile_m, tile_n=tile_n,
                             pred_dtype=pred_dtype)
    rule = _rule_scores_call(h_bf, e2_rows, tile_m=tile_m)
    return pred, rule


# ---------------------------------------------------------------------------
# One-time table preparation + forward wrapper (mirrors LFramework.forward)
# ---------------------------------------------------------------------------

def prepare_kg_tables(entity_embeddings, relation_embeddings, *,
                      tile_n=1024, resident_ok=True):
    """One-time table preparation (in LFramework this would happen at module init /
    checkpoint load, NOT per forward() call): cast to bf16, pad the feature dim to a
    multiple of 128 lanes (zero columns are mathematically inert for both the matmul
    and the row-sum), and pad the entity rows to a whole number of entity tiles."""
    num_ent, dim = entity_embeddings.shape
    num_rel = relation_embeddings.shape[0]
    dim_pad = _round_up(dim, 128)
    tile_n = min(tile_n, _round_up(num_ent, 128))

    if resident_ok:
        # If the padded table is comfortably small vs. the generation's VMEM budget
        # (double-buffering + pred/h blocks included, hence the conservative /8),
        # merge all entity tiles into one: the entity BlockSpec index is then
        # constant, so the table is DMAed from HBM exactly once and stays resident
        # in VMEM across every row tile instead of being re-streamed per row tile.
        table_bytes = _round_up(num_ent, 128) * dim_pad * 2
        if table_bytes * 8 <= _vmem_limit_bytes():
            tile_n = _round_up(num_ent, 128)

    n_ent_pad = _round_up(num_ent, tile_n)

    ent_bf = jnp.zeros((n_ent_pad, dim_pad), jnp.bfloat16)
    ent_bf = ent_bf.at[:num_ent, :dim].set(entity_embeddings.astype(jnp.bfloat16))
    rel_bf = jnp.zeros((num_rel, dim_pad), jnp.bfloat16)
    rel_bf = rel_bf.at[:, :dim].set(relation_embeddings.astype(jnp.bfloat16))

    return {
        "entity_bf16": ent_bf,        # (n_ent_pad, dim_pad)
        "relation_bf16": rel_bf,      # (num_rel, dim_pad)
        "num_entities": num_ent,
        "dim": dim,
        "tile_n": int(tile_n),
    }


def _pad_ids(ids, total, fill):
    pad = total - ids.shape[0]
    if pad == 0:
        return ids
    return jnp.concatenate([ids, jnp.full((pad,), fill, ids.dtype)])


def lframework_forward(e1_ids, e2_ids, r_ids, tables, batch_size,
                       dummy_e=0, dummy_r=0, *, tile_m=256,
                       pred_dtype=jnp.bfloat16):
    """Mirror of LFramework.forward(): the mini-batch loop + make_full_batch become a
    single pad to a multiple of the row tile (per-row results are identical), one
    predict() over the padded example list, then un-pad (slice + concat)."""
    del batch_size  # Per-row results do not depend on the framework mini-batch size;
                    # the MXU-facing row tile (tile_m) replaces that loop.

    n = int(e1_ids.shape[0])
    ent_bf = tables["entity_bf16"]
    rel_bf = tables["relation_bf16"]
    num_ent = tables["num_entities"]
    tile_n = tables["tile_n"]
    n_ent_pad = ent_bf.shape[0]

    # Clip the row tile for tiny example lists; keep it a multiple of 128 so the
    # pred blocks stay MXU-shaped and the rule output stays lane-dense.
    tile_m = min(tile_m, _round_up(max(n, 1), 128))
    m_pad = _round_up(max(n, 1), tile_m)

    # make_full_batch: append dummy triples so every row tile is full.
    e1_p = _pad_ids(e1_ids, m_pad, dummy_e)
    e2_p = _pad_ids(e2_ids, m_pad, dummy_e)
    r_p = _pad_ids(r_ids, m_pad, dummy_r)

    pred_padded, rule_padded = _predict_padded(
        e1_p, e2_p, r_p, ent_bf, rel_bf,
        tile_m=tile_m, tile_n=tile_n, pred_dtype=pred_dtype)

    # pred_score[:mini_batch_size] slicing + torch.cat == drop padded rows/cols.
    # Slices only materialize when padding actually exists.
    # TODO(synk): consumers could accept the padded array + logical (n, num_ent) to
    # skip this re-read/re-write of the largest tensor entirely.
    pred_scores = pred_padded
    if n_ent_pad != num_ent:
        pred_scores = pred_scores[:, :num_ent]
    if m_pad != n:
        pred_scores = pred_scores[:n]
        rule_scores = rule_padded[:n]
    else:
        rule_scores = rule_padded
    return pred_scores, rule_scores
    # TODO(synk): run_train bookkeeping (Adam loop, grad clipping, checkpointing,
    # tensorboard logging, early stopping) has no Pallas equivalent.


if __name__ == "__main__":
    key = jax.random.PRNGKey(0)
    k_ent, k_rel, k_e1, k_e2, k_r = jax.random.split(key, 5)

    num_entities = 200
    num_relations = 16
    dim = 32
    dev_batch_size = 64          # framework mini-batch size (results identical per row)
    num_examples = 150           # not a multiple of the tile -> exercises make_full_batch

    entity_embeddings = jax.random.normal(k_ent, (num_entities, dim), jnp.float32) * 0.1
    relation_embeddings = jax.random.normal(k_rel, (num_relations, dim), jnp.float32) * 0.1

    e1_ids = jax.random.randint(k_e1, (num_examples,), 0, num_entities, jnp.int32)
    e2_ids = jax.random.randint(k_e2, (num_examples,), 0, num_entities, jnp.int32)
    r_ids = jax.random.randint(k_r, (num_examples,), 0, num_relations, jnp.int32)

    # Tables prepared ONCE (bf16 cast + lane/row padding hoisted out of forward).
    # resident_ok=False + tile_n=128 so the tiny demo still exercises the streamed
    # 2-D (row tile x entity tile) grid; production defaults are tile_n=1024 with
    # automatic VMEM residency when the table fits the generation's budget.
    tables = prepare_kg_tables(entity_embeddings, relation_embeddings,
                               tile_n=128, resident_ok=False)

    pred_scores, rule_scores = lframework_forward(
        e1_ids, e2_ids, r_ids, tables, batch_size=dev_batch_size, tile_m=128)
    jax.block_until_ready((pred_scores, rule_scores))

    # Reference check in plain f32 JAX (kernel path uses bf16 operands / bf16 pred).
    h_ref = entity_embeddings[e1_ids] * relation_embeddings[r_ids]
    pred_ref = jax.nn.sigmoid(h_ref @ entity_embeddings.T)
    rule_ref = jax.nn.sigmoid(jnp.sum(h_ref * entity_embeddings[e2_ids], axis=-1))
    assert pred_scores.shape == (num_examples, num_entities)
    assert rule_scores.shape == (num_examples,)
    assert jnp.allclose(pred_scores.astype(jnp.float32), pred_ref, atol=5e-3)
    assert jnp.allclose(rule_scores, rule_ref, atol=1e-3)

    print("KERNEL_OK")
</pallas_src>

<mosaic_0001>
module attributes {stable_mosaic.version = 11 : i64} {
  func.func @_rule_kernel(%arg0: i32, %arg1: memref<128x128xbf16, #tpu.memory_space<vmem>>, %arg2: memref<128x128xbf16, #tpu.memory_space<vmem>>, %arg3: memref<1x128xf32, #tpu.memory_space<vmem>>) attributes {dimension_semantics = [#tpu.dimension_semantics<parallel>], iteration_bounds = array<i64: 2>, scalar_prefetch = 0 : i64, scratch_operands = 0 : i64, tpu.core_type = #tpu.core_type<tc>, window_params = [{transform_indices = @transform_0, window_bounds = array<i64: 128, 128>}, {transform_indices = @transform_1, window_bounds = array<i64: 128, 128>}, {transform_indices = @transform_2, window_bounds = array<i64: 1, 128>}]} {
    %c0 = arith.constant 0 : index
    %c0_0 = arith.constant 0 : index
    %0 = vector.load %arg1[%c0, %c0_0] : memref<128x128xbf16, #tpu.memory_space<vmem>>, vector<128x128xbf16>
    %1 = arith.extf %0 : vector<128x128xbf16> to vector<128x128xf32>
    %c0_1 = arith.constant 0 : index
    %c0_2 = arith.constant 0 : index
    %2 = vector.load %arg2[%c0_1, %c0_2] : memref<128x128xbf16, #tpu.memory_space<vmem>>, vector<128x128xbf16>
    %3 = arith.extf %2 : vector<128x128xbf16> to vector<128x128xf32>
    %4 = arith.mulf %1, %3 : vector<128x128xf32>
    %cst = arith.constant 1.000000e+00 : bf16
    %5 = vector.broadcast %cst : bf16 to vector<1x128xbf16>
    %6 = arith.truncf %4 : vector<128x128xf32> to vector<128x128xbf16>
    %cst_3 = arith.constant dense<0.000000e+00> : vector<1x128xf32>
    %7 = tpu.matmul %5, %6, %cst_3 {dimension_numbers = #tpu.dot_dimension_numbers<[1], [1], [0], [0], [0, 0, 1, 0], [], []>} : vector<1x128xbf16>, vector<128x128xbf16>, vector<1x128xf32> -> vector<1x128xf32>
    %cst_4 = arith.constant 5.000000e-01 : f32
    %8 = vector.broadcast %cst_4 : f32 to vector<1x128xf32>
    %9 = arith.mulf %8, %7 : vector<1x128xf32>
    %10 = math.tanh %9 : vector<1x128xf32>
    %cst_5 = arith.constant 5.000000e-01 : f32
    %11 = vector.broadcast %cst_5 : f32 to vector<1x128xf32>
    %12 = arith.mulf %11, %10 : vector<1x128xf32>
    %cst_6 = arith.constant 5.000000e-01 : f32
    %13 = vector.broadcast %cst_6 : f32 to vector<1x128xf32>
    %14 = arith.addf %12, %13 : vector<1x128xf32>
    %c0_7 = arith.constant 0 : index
    %c0_8 = arith.constant 0 : index
    %15 = vector.load %arg3[%c0_7, %c0_8] : memref<1x128xf32, #tpu.memory_space<vmem>>, vector<1x128xf32>
    tpu.vector_store %arg3[%c0_7, %c0_8], %14 {strides = array<i32>} : memref<1x128xf32, #tpu.memory_space<vmem>>, vector<1x128xf32>,
    return
  }
  func.func @transform_0(%arg0: i32) -> (i32, i32) {
    %c0_i32 = arith.constant 0 : i32
    %c0_i32_0 = arith.constant 0 : i32
    return %arg0, %c0_i32 : i32, i32
  }
  func.func @transform_1(%arg0: i32) -> (i32, i32) {
    %c0_i32 = arith.constant 0 : i32
    %c0_i32_0 = arith.constant 0 : i32
    return %arg0, %c0_i32 : i32, i32
  }
  func.func @transform_2(%arg0: i32) -> (i32, i32) {
    %c0_i32 = arith.constant 0 : i32
    %c0_i32_0 = arith.constant 0 : i32
    return %c0_i32, %arg0 : i32, i32
  }
}

module attributes {stable_mosaic.version = 11 : i64} {
  func.func @_pred_kernel(%arg0: i32, %arg1: i32, %arg2: memref<128x128xbf16, #tpu.memory_space<vmem>>, %arg3: memref<128x128xbf16, #tpu.memory_space<vmem>>, %arg4: memref<128x128xbf16, #tpu.memory_space<vmem>>) attributes {dimension_semantics = [#tpu.dimension_semantics<parallel>, #tpu.dimension_semantics<parallel>], iteration_bounds = array<i64: 2, 2>, scalar_prefetch = 0 : i64, scratch_operands = 0 : i64, tpu.core_type = #tpu.core_type<tc>, window_params = [{transform_indices = @transform_0, window_bounds = array<i64: 128, 128>}, {transform_indices = @transform_1, window_bounds = array<i64: 128, 128>}, {transform_indices = @transform_2, window_bounds = array<i64: 128, 128>}]} {
    %c0 = arith.constant 0 : index
    %c0_0 = arith.constant 0 : index
    %0 = vector.load %arg2[%c0, %c0_0] : memref<128x128xbf16, #tpu.memory_space<vmem>>, vector<128x128xbf16>
    %c0_1 = arith.constant 0 : index
    %c0_2 = arith.constant 0 : index
    %1 = vector.load %arg3[%c0_1, %c0_2] : memref<128x128xbf16, #tpu.memory_space<vmem>>, vector<128x128xbf16>
    %cst = arith.constant dense<0.000000e+00> : vector<128x128xf32>
    %2 = tpu.matmul %0, %1, %cst {dimension_numbers = #tpu.dot_dimension_numbers<[1], [1], [0], [0], [0, 0, 1, 0], [], []>} : vector<128x128xbf16>, vector<128x128xbf16>, vector<128x128xf32> -> vector<128x128xf32>
    %cst_3 = arith.constant 5.000000e-01 : f32
    %3 = vector.broadcast %cst_3 : f32 to vector<128x128xf32>
    %4 = arith.mulf %3, %2 : vector<128x128xf32>
    %5 = math.tanh %4 : vector<128x128xf32>
    %cst_4 = arith.constant 5.000000e-01 : f32
    %6 = vector.broadcast %cst_4 : f32 to vector<128x128xf32>
    %7 = arith.mulf %6, %5 : vector<128x128xf32>
    %cst_5 = arith.constant 5.000000e-01 : f32
    %8 = vector.broadcast %cst_5 : f32 to vector<128x128xf32>
    %9 = arith.addf %7, %8 : vector<128x128xf32>
    %10 = arith.truncf %9 : vector<128x128xf32> to vector<128x128xbf16>
    %c0_6 = arith.constant 0 : index
    %c0_7 = arith.constant 0 : index
    %11 = vector.load %arg4[%c0_6, %c0_7] : memref<128x128xbf16, #tpu.memory_space<vmem>>, vector<128x128xbf16>
    tpu.vector_store %arg4[%c0_6, %c0_7], %10 {strides = array<i32>} : memref<128x128xbf16, #tpu.memory_space<vmem>>, vector<128x128xbf16>,
    return
  }
  func.func @transform_0(%arg0: i32, %arg1: i32) -> (i32, i32) {
    %c0_i32 = arith.constant 0 : i32
    %c0_i32_0 = arith.constant 0 : i32
    return %arg0, %c0_i32 : i32, i32
  }
  func.func @transform_1(%arg0: i32, %arg1: i32) -> (i32, i32) {
    %c0_i32 = arith.constant 0 : i32
    %c0_i32_0 = arith.constant 0 : i32
    return %arg1, %c0_i32 : i32, i32
  }
  func.func @transform_2(%arg0: i32, %arg1: i32) -> (i32, i32) {
    %c0_i32 = arith.constant 0 : i32
    return %arg0, %arg1 : i32, i32
  }
}

</mosaic_0001>

<bundles_post_ra>
// kernel: _predict_padded.3
= control target key start
LH: loop header
LB: loop body
LE: loop exit
PB: predicated region body
PF: predicated region fallthrough
CT: control target
= control target key end

     0   :  { %7 = vsyncpa [#allocation3], 0  ;;  %s669_s0 = inlined_call_operand.vmem [shape: bf16[256,128], index: 0, kind: input, shape index: {}]   ;;  %s670_s1 = inlined_call_operand.vmem [shape: bf16[256,128], index: 1, kind: input, shape index: {}]   ;;  %s671_s2 = inlined_call_operand.hbm [shape: f32[1,256], index: 2, kind: output, shape index: {}]  }
   0x1   :  { %9 = vsyncpa [#allocation3 + $0x1], 0  ;;  %s562_s9 = smov 0   ;;  %s564_s10 = smov 0  }
   0x2   :  { %s566_s11 = smov 0   ;;  %s568_s12 = smov 0  }
   0x3 LB: > { %s583_s13 = sadd.s32 4294967295, %s544_s12   ;;  %s352_s14 = sadd.s32 4294967294, %s544_s12   ;;  %s544_s12 = sphi %s568_s12, %s677_s12   ;;  %s540_s11 = sphi %s566_s11, %s676_s11   ;;  %s536_s10 = sphi %s564_s10, %s675_s10   ;;  %s532_s9 = sphi %s562_s9, %s674_s9  }
   0x4   : > { %s587_s15 = sadd.s32 1, %s544_s12   ;;  %s74_s16 = sadd.s32 1, %s540_s11 }
   0x5   : > { %s71_s17 = ssub.s32 %s544_s12, %s587_s15  ;;  %p84_p0 = scmp.ne.s32.totalorder %s540_s11, %s536_s10 }
   0x6   : > { %p72_p1 = scmp.eq.s32.totalorder %s71_s17, 0  ;;  %p85_p2 = scmp.eq.s32.totalorder %s583_s13, 1 }
   0x7   : > { %p90_p3 = scmp.ne.s32.totalorder %s536_s10, %s532_s9  ;;  %p91_p4 = scmp.eq.s32.totalorder %s352_s14, 1 }
   0x8   : > { %s598_s18 = scalar_select %p72_p1, %s540_s11, %s74_s16  }
   0x9   : > { %p600_p5 = por %p85_p2, %p84_p0  ;;  %p604_p6 = por %p91_p4, %p90_p3 }
   0xa   : > { %p355_p7 = scmp.ge.s32.totalorder %s544_s12, 1  ;;  %p127_p8 = scmp.lt.s32.totalorder %s544_s12, 3 }
   0xc   : > { %p128_p9 = pnand %p355_p7, %p127_p8 }
   0xd   : > { %s356_s21 = sshll.u32 (!%p128_p9), %s583_s13, 4  ;;  %s151_s29 = sand.u32 (!%p128_p9), 1, %s536_s10  }
   0xe   : > { %131 = sbr.rel (%p128_p9) target bundleno = 235 (0xeb), region = 28  ;;  %p154_p10 = scmp.lt.s32.totalorder (!%p128_p9), %s356_s21, 31 }
   0xf   : > { %s281_s4 = scalar_lea.hbm (!%p128_p9), %s671_s2, %s583_s13  ;;  %s152_s5 = scalar_lea.vmem (!%p128_p9), [#allocation2], %s151_s29 }
  0x10   : > { %s283_s6 = sshll.u32 (!%p128_p9), %s152_s5, 4  ;;  %s285_s7 = sshll.u32 (!%p128_p9), %s281_s4, 4  ;;  %s284_s6 = int_to_ptr.vmem [resolvable:$true] %s283_s6  ;;  %s286_s7 = int_to_ptr.hbm [resolvable:$true] %s285_s7 }
  0x11   : > { %s273_s8 = scalar_lea.sflag (!%p128_p9), [#allocation3], %s151_s29  ;;  %s496_s14 = sshra.s32 (!%p128_p9), %s286_s7, 4  ;;  %s497_s14 = int_to_ptr.hbm [resolvable:$true] %s496_s14 }
  0x12   : > { %s498_s16 = scalar_lea.hbm (!%p128_p9), %s497_s14, 1  ;;  %p503_p0 = scmp.lt.s32.totalorder (!%p128_p9), %s497_s14, %s671_s2 }
  0x13   : > { %s679_s21 = smov (!%p154_p10, %s356_s21), 31  ;;  %p499_p11 = scmp.ne.s32.totalorder %s497_s14, %s498_s16 }
  0x14   : > { %s357_s22 = sshll.u32 %s679_s21, 2  ;;  %s502_s21 = scalar_lea.hbm %s671_s2, 2 }
  0x15   : > { %s614_s25 = scalar_lea.vmem %s669_s0, %s357_s22  ;;  %s619_s28 = scalar_lea.vmem %s670_s1, %s357_s22 }
  0x16   : > { %v432_v0 = vld [vmem:[%s614_s25 + $0x38] sm:$0xff]   ;;  %v431_v2 = vld [vmem:[%s614_s25 + $0x30] sm:$0xff]   ;;  %v430_v17 = vld [vmem:[%s614_s25 + $0x28] sm:$0xff]   ;;  %p500_p12 = pnand %p499_p11, %p600_p5  ;;  %p504_p1 = scmp.lt.s32.totalorder %s502_s21, %s498_s16 }
  0x17   : > { %v439_v1 = vld [vmem:[%s619_s28 + $0x38] sm:$0xff]   ;;  %v392_v3 = vunpack.c.l.bf16 %v432_v0  ;;  %v393_v4 = vunpack.c.h.bf16 %v432_v0  ;;  %v438_v7 = vld [vmem:[%s619_s28 + $0x30] sm:$0xff]   ;;  %v388_v8 = vunpack.c.l.bf16 %v431_v2  ;;  %v389_v9 = vunpack.c.h.bf16 %v431_v2  ;;  %v437_v18 = vld [vmem:[%s619_s28 + $0x28] sm:$0xff]  }
  0x18   : > { %v424_v5 = vunpack.c.l.bf16 %v439_v1  ;;  %v425_v6 = vunpack.c.h.bf16 %v439_v1  ;;  %v420_v12 = vunpack.c.l.bf16 %v438_v7  ;;  %v421_v13 = vunpack.c.h.bf16 %v438_v7  ;;  %v429_v26 = vld [vmem:[%s614_s25 + $0x20] sm:$0xff]   ;;  %v428_v35 = vld [vmem:[%s614_s25 + $0x18] sm:$0xff]   ;;  %v427_v44 = vld [vmem:[%s614_s25 + $0x10] sm:$0xff]   ;;  %p501_p13 = pneg %p500_p12  ;;  %p505_p2 = por %p504_p1, %p503_p0 }
  0x19   : > { %v384_v19 = vunpack.c.l.bf16 %v430_v17  ;;  %v385_v21 = vunpack.c.h.bf16 %v430_v17  ;;  %v416_v22 = vunpack.c.l.bf16 %v437_v18  ;;  %v417_v23 = vunpack.c.h.bf16 %v437_v18  ;;  %v436_v27 = vld [vmem:[%s619_s28 + $0x20] sm:$0xff]   ;;  %v435_v36 = vld [vmem:[%s619_s28 + $0x18] sm:$0xff]   ;;  %v434_v45 = vld [vmem:[%s619_s28 + $0x10] sm:$0xff]  }
  0x1a   : > { %v244_v10 = vmul.f32 %v424_v5, %v392_v3  ;;  %v245_v11 = vmul.f32 %v425_v6, %v393_v4  ;;  %v242_v15 = vmul.f32 %v420_v12, %v388_v8  ;;  %v243_v16 = vmul.f32 %v421_v13, %v389_v9  ;;  %v426_v53 = vld [vmem:[%s614_s25 + $0x8] sm:$0xff]   ;;  %v363_v62 = vld [vmem:[%s614_s25] sm:$0xff]   ;;  %p506_p3 = pnand %p505_p2, %p501_p13 }
  0x1b   : > { %v240_v24 = vmul.f32 %v416_v22, %v384_v19  ;;  %v241_v25 = vmul.f32 %v417_v23, %v385_v21  ;;  %v380_v28 = vunpack.c.l.bf16 %v429_v26  ;;  %v381_v30 = vunpack.c.h.bf16 %v429_v26  ;;  %v433_v54 = vld [vmem:[%s619_s28 + $0x8] sm:$0xff]   ;;  %v395_v63 = vld [vmem:[%s619_s28] sm:$0xff]  }
  0x1c   : > { %v253_v14 = vpack.c.bf16 %v245_v11, %v244_v10  ;;  %v252_v20 = vpack.c.bf16 %v243_v16, %v242_v15  ;;  %v412_v31 = vunpack.c.l.bf16 %v436_v27  ;;  %v413_v32 = vunpack.c.h.bf16 %v436_v27 }
  0x1d   : > { %v251_v29 = vpack.c.bf16 %v241_v25, %v240_v24  ;;  %v376_v37 = vunpack.c.l.bf16 %v428_v35  ;;  %v377_v39 = vunpack.c.h.bf16 %v428_v35  ;;  %v408_v40 = vunpack.c.l.bf16 %v435_v36 }
  0x1e   : > { %254 = vmatpush.bf16.xpose.msra.mxu0 %v253_v14  ;;  %v238_v33 = vmul.f32 %v412_v31, %v380_v28  ;;  %v239_v34 = vmul.f32 %v413_v32, %v381_v30  ;;  %v409_v41 = vunpack.c.h.bf16 %v435_v36  ;;  %v372_v46 = vunpack.c.l.bf16 %v427_v44 }
  0x1f   : > { %v236_v42 = vmul.f32 %v408_v40, %v376_v37  ;;  %v373_v48 = vunpack.c.h.bf16 %v427_v44  ;;  %v404_v49 = vunpack.c.l.bf16 %v434_v45  ;;  %v405_v50 = vunpack.c.h.bf16 %v434_v45 }
  0x20   : > { %v250_v38 = vpack.c.bf16 %v239_v34, %v238_v33  ;;  %v237_v43 = vmul.f32 %v409_v41, %v377_v39  ;;  %v368_v55 = vunpack.c.l.bf16 %v426_v53  ;;  %v369_v56 = vunpack.c.h.bf16 %v426_v53 }
  0x21   : > { %v234_v51 = vmul.f32 %v404_v49, %v372_v46  ;;  %v235_v52 = vmul.f32 %v405_v50, %v373_v48  ;;  %v400_v57 = vunpack.c.l.bf16 %v433_v54  ;;  %v401_v58 = vunpack.c.h.bf16 %v433_v54 }
  0x22   : > { %v249_v47 = vpack.c.bf16 %v237_v43, %v236_v42  ;;  %v364_v1 = vunpack.c.l.bf16 %v363_v62  ;;  %v365_v2 = vunpack.c.h.bf16 %v363_v62  ;;  %v396_v3 = vunpack.c.l.bf16 %v395_v63 }
  0x23   : > { %v248_v59 = vpack.c.bf16 %v235_v52, %v234_v51  ;;  %v232_v60 = vmul.f32 %v400_v57, %v368_v55  ;;  %v233_v61 = vmul.f32 %v401_v58, %v369_v56  ;;  %v397_v4 = vunpack.c.h.bf16 %v395_v63 }
  0x24   : > { %v230_v5 = vmul.f32 %v396_v3, %v364_v1  ;;  %v546_v8 = vmov 1065369472  }
  0x25   : > { %v247_v0 = vpack.c.bf16 %v233_v61, %v232_v60  ;;  %v231_v6 = vmul.f32 %v397_v4, %v365_v2 }
  0x26   : > { %255 = vmatpush.bf16.xpose.msra.mxu0 %v252_v20 }
  0x27   : > { %v246_v7 = vpack.c.bf16 %v231_v6, %v230_v5 }
  0x2e   : > { %256 = vmatpush.bf16.xpose.msra.mxu0 %v251_v29 }
  0x36   : > { %257 = vmatpush.bf16.xpose.msra.mxu0 %v250_v38 }
  0x3e   : > { %258 = vmatpush.bf16.xpose.msra.mxu0 %v249_v47 }
  0x46   : > { %259 = vmatpush.bf16.xpose.msra.mxu0 %v248_v59 }
  0x4e   : > { %260 = vmatpush.bf16.xpose.msra.mxu0 %v247_v0 }
  0x56   : > { %261 = vmatpush.bf16.xpose.msra.mxu0 %v246_v7 }
  0x5d   : > { %262 = vmatmul.bf16.vlgmr.msra.gmra.mxu0 %v546_v8 }
  0xda   : > { %v263_v9 = vpop.f32.mrf.mxu0 }
  0xdb   : > { %v267_v10 = vmul.f32 0.5, %v263_v9 }
  0xdd   : > { %480 = vtanh.f32 %v267_v10 }
  0xe2   : > { %v265_v11 = vpop.f32.mrf.mxu0 }
  0xe3   : > { %v481_v12 = vpop.eup %480 }
  0xe4   : > { %v269_v13 = vmul.f32 0.5, %v481_v12 }
  0xe6   : > { %v270_v14 = vadd.f32 0.5, %v269_v13 }
  0xe8   : > { %271 = vst [vmem:[%s152_s5] sm:$0x1] %v270_v14 }
  0xe9   : > { %509 = shalt.err (!%p506_p3)
}
  0xea   : > { %440 = dma.vmem_to_hbm [thread:$0]  (%p600_p5), %s284_s6, 16, %s286_s7, %s273_s8  }
  0xeb PF: > { %p446_p4 = scmp.ge.s32.totalorder %s544_s12, 2  ;;  %s297_s24 = sand.u32 1, %s532_s9  }
  0xec   : > { %s298_s25 = scalar_lea.sflag [#allocation3], %s297_s24 }
  0xed   : > { %p443_p7 = pnand %p446_p4, %p604_p6 }
  0xef   : > { %p444_p8 = pneg %p443_p7 }
  0xf1   : > { %527 = dma.done.wait (%p444_p8), %s298_s25, 16  }
  0xf2   : > { %529 = vsyncadd (%p444_p8), %s298_s25, 4294967280  ;;  %p12_p9 = scmp.ge.s32.totalorder %s587_s15, 4   ;;  %s674_s9 = smov %s536_s10 }
  0xf3   : > { %s675_s10 = smov %s540_s11  ;;  %s676_s11 = smov %s598_s18 }
  0xf4   : > { %s677_s12 = smov %s587_s15  ;;  %14 = sbr.rel (!%p12_p9) target bundleno = 3 (0x3), region = 66 }
  0xf9   :  { %303 = vsyncpa [#allocation3], 1 }
  0xfa   :  { %305 = vsyncpa [#allocation3 + $0x1], 1 }

// kernel: _predict_padded.2
= control target key start
LH: loop header
LB: loop body
LE: loop exit
PB: predicated region body
PF: predicated region fallthrough
CT: control target
= control target key end

     0   :  { %7 = vsyncpa [#allocation3], 0  ;;  %s1095_s0 = inlined_call_operand.vmem [shape: bf16[256,128], index: 0, kind: input, shape index: {}]   ;;  %s1096_s1 = inlined_call_operand.vmem [shape: bf16[256,128], index: 1, kind: input, shape index: {}]   ;;  %s1097_s2 = inlined_call_operand.hbm [shape: bf16[256,256], index: 2, kind: output, shape index: {}]  }
   0x1   :  { %9 = vsyncpa [#allocation3 + $0x1], 0  ;;  %s947_s9 = smov 0   ;;  %s949_s10 = smov 0  }
   0x2   :  { %s951_s11 = smov 0   ;;  %s953_s12 = smov 0  }
   0x3   :  { %s955_s13 = smov 0   ;;  %s957_s14 = smov 0  }
   0x4   :  { %s959_s15 = smov 0   ;;  %s961_s16 = smov 0  }
   0x5 LB: > { %s559_s17 = sadd.s32 4294967295, %s927_s16   ;;  %s560_s18 = sadd.s32 4294967294, %s927_s16   ;;  %s927_s16 = sphi %s961_s16, %s15_s16   ;;  %s923_s15 = sphi %s959_s15, %s1106_s15   ;;  %s919_s14 = sphi %s957_s14, %s1105_s14   ;;  %s915_s13 = sphi %s955_s13, %s1104_s13   ;;  %s911_s12 = sphi %s953_s12, %s1103_s12   ;;  %s907_s11 = sphi %s951_s11, %s1102_s11   ;;  %s903_s10 = sphi %s949_s10, %s1101_s10   ;;  %s899_s9 = sphi %s947_s9, %s1100_s9  }
   0x6   : > { %s24_s19 = sadd.s32 1, %s919_s14  ;;  %s27_s20 = sadd.s32 1, %s923_s15 }
   0x7   : > { %p25_p0 = scmp.ge.s32.totalorder %s24_s19, 2  ;;  %p98_p1 = scmp.ne.s32.totalorder %s907_s11, %s903_s10 }
   0x8   : > { %p99_p2 = scmp.eq.s32.totalorder %s559_s17, 3  ;;  %p104_p5 = scmp.ne.s32.totalorder %s903_s10, %s899_s9 }
   0x9   : > { %s1108_s19 = smov (%p25_p0, %s24_s19), 0  ;;  %s1110_s20 = smov (!%p25_p0, %s27_s20), %s923_s15 }
   0xa   : > { %s84_s21 = ssub.s32 %s919_s14, %s1108_s19  ;;  %p998_p3 = por %p99_p2, %p98_p1 }
   0xb   : > { %p29_p4 = scmp.ge.s32.totalorder %s1110_s20, 2  ;;  %p105_p6 = scmp.eq.s32.totalorder %s560_s18, 3 }
   0xc   : > { %p563_p7 = scmp.ge.s32.totalorder %s927_s16, 1  ;;  %p141_p9 = scmp.lt.s32.totalorder %s927_s16, 5 }
   0xd   : > { %s1112_s20 = smov (%p29_p4, %s1110_s20), 0  ;;  %p1007_p8 = por %p105_p6, %p104_p5 }
   0xe   : > { %s83_s24 = ssub.s32 %s923_s15, %s1112_s20  ;;  %s88_s25 = sadd.s32 1, %s907_s11 }
   0xf   : > { %s85_s26 = sor.u32 %s84_s21, %s83_s24  ;;  %p142_p10 = pnand %p563_p7, %p141_p9 }
  0x10   : > { %p86_p11 = scmp.eq.s32.totalorder %s85_s26, 0  ;;  %s567_s28 = sshll.u32 (!%p142_p10), %s911_s12, 4 }
  0x11   : > { %145 = sbr.rel (%p142_p10) target bundleno = 267 (0x10b), region = 28  ;;  %p175_p12 = scmp.lt.s32.totalorder (!%p142_p10), %s567_s28, 31 }
  0x12   : > { %s1016_s27 = scalar_select %p86_p11, %s907_s11, %s88_s25  }
  0x13   : > { %s565_s5 = sshll.u32 (!%p142_p10), %s915_s13, 4  ;;  %s165_s18 = sand.u32 (!%p142_p10), 1, %s903_s10  }
  0x14   : > { %p169_p13 = scmp.lt.s32.totalorder (!%p142_p10), %s565_s5, 31  ;;  %s564_s21 = sshll.u32 (!%p142_p10), %s165_s18, 6 }
  0x15   : > { %s1039_s24 = scalar_lea.vmem (!%p142_p10), [#allocation2], %s564_s21  ;;  %s655_s25 = sshll.u32 (!%p142_p10), %s915_s13, 5 }
  0x16   : > { %s1114_s28 = smov (!%p175_p12, %s567_s28), 31  ;;  %s1116_s5 = smov (!%p169_p13, %s565_s5), 31 }
  0x17   : > { %s568_s29 = sshll.u32 %s1114_s28, 2  ;;  %s566_s6 = sshll.u32 %s1116_s5, 2 }
  0x18   : > { %s1022_s4 = scalar_lea.vmem %s1096_s1, %s568_s29  ;;  %s172_s17 = scalar_lea.vmem %s1095_s0, %s566_s6 }
  0x19   : > { %v654_v0 = vld [vmem:[%s1022_s4 + $0x38] sm:$0xff]  ;;  %v653_v1 = vld [vmem:[%s1022_s4 + $0x30] sm:$0xff]  ;;  %v652_v2 = vld [vmem:[%s1022_s4 + $0x28] sm:$0xff]  ;;  %s466_s26 = sadd.s32 %s911_s12, %s655_s25  ;;  %s469_s30 = sshll.u32 %s1039_s24, 4  ;;  %s470_s30 = int_to_ptr.vmem [resolvable:$true] %s469_s30 }
  0x1a   : > { %309 = vmatpush.bf16.xpose.msra.mxu0 %v654_v0  ;;  %703 = vmatpush.bf16.xpose.msra.mxu1 %v654_v0  ;;  %v651_v3 = vld [vmem:[%s1022_s4 + $0x20] sm:$0xff]  ;;  %v650_v4 = vld [vmem:[%s1022_s4 + $0x18] sm:$0xff]  ;;  %v649_v5 = vld [vmem:[%s1022_s4 + $0x10] sm:$0xff]  ;;  %s636_s13 = sshll.u32 %s466_s26, 2 }
  0x1b   : > { %704 = vmatpush.bf16.xpose.msra.mxu2 %v654_v0  ;;  %705 = vmatpush.bf16.xpose.msra.mxu3 %v654_v0  ;;  %v648_v6 = vld [vmem:[%s1022_s4 + $0x8] sm:$0xff]  ;;  %v647_v7 = vld [vmem:[%s1022_s4] sm:$0xff]  ;;  %v641_v9 = vld [vmem:[%s172_s17 + $0x10] sm:$0xff]  ;;  %s468_s29 = scalar_lea.hbm %s1097_s2, %s636_s13  ;;  %s455_s4 = scalar_lea.sflag [#allocation3], %s165_s18 }
  0x1c   : > { %v639_v8 = vld [vmem:[%s172_s17] sm:$0xff]  ;;  %v645_v11 = vld [vmem:[%s172_s17 + $0x30] sm:$0xff]  ;;  %v640_v12 = vld [vmem:[%s172_s17 + $0x8] sm:$0xff]  ;;  %s471_s3 = sshll.u32 %s468_s29, 4  ;;  %s472_s3 = int_to_ptr.hbm [resolvable:$true] %s471_s3 }
  0x1d   : > { %v643_v10 = vld [vmem:[%s172_s17 + $0x20] sm:$0xff]  ;;  %v642_v13 = vld [vmem:[%s172_s17 + $0x18] sm:$0xff]  ;;  %v644_v14 = vld [vmem:[%s172_s17 + $0x28] sm:$0xff]  ;;  %s847_s5 = sshra.s32 %s472_s3, 4  ;;  %s848_s5 = int_to_ptr.hbm [resolvable:$true] %s847_s5 }
  0x1e   : > { %v646_v15 = vld [vmem:[%s172_s17 + $0x38] sm:$0xff]  ;;  %s849_s6 = scalar_lea.hbm %s848_s5, 64  ;;  %s853_s17 = scalar_lea.hbm %s1097_s2, 256 }
  0x1f   : > { %p850_p0 = scmp.ne.s32.totalorder %s848_s5, %s849_s6  ;;  %p854_p4 = scmp.lt.s32.totalorder %s848_s5, %s1097_s2 }
  0x20   : > { %p855_p5 = scmp.lt.s32.totalorder %s853_s17, %s849_s6 }
  0x21   : > { %p851_p1 = pnand %p850_p0, %p998_p3 }
  0x22   : > { %310 = vmatpush.bf16.xpose.msra.mxu0 %v653_v1  ;;  %706 = vmatpush.bf16.xpose.msra.mxu1 %v653_v1  ;;  %p856_p6 = por %p855_p5, %p854_p4 }
  0x23   : > { %707 = vmatpush.bf16.xpose.msra.mxu2 %v653_v1  ;;  %708 = vmatpush.bf16.xpose.msra.mxu3 %v653_v1  ;;  %p852_p2 = pneg %p851_p1 }
  0x25   : > { %p857_p7 = pnand %p856_p6, %p852_p2 }
  0x2a   : > { %311 = vmatpush.bf16.xpose.msra.mxu0 %v652_v2  ;;  %709 = vmatpush.bf16.xpose.msra.mxu1 %v652_v2 }
  0x2b   : > { %710 = vmatpush.bf16.xpose.msra.mxu2 %v652_v2  ;;  %711 = vmatpush.bf16.xpose.msra.mxu3 %v652_v2 }
  0x32   : > { %312 = vmatpush.bf16.xpose.msra.mxu0 %v651_v3  ;;  %712 = vmatpush.bf16.xpose.msra.mxu1 %v651_v3 }
  0x33   : > { %713 = vmatpush.bf16.xpose.msra.mxu2 %v651_v3  ;;  %714 = vmatpush.bf16.xpose.msra.mxu3 %v651_v3 }
  0x3a   : > { %313 = vmatpush.bf16.xpose.msra.mxu0 %v650_v4  ;;  %715 = vmatpush.bf16.xpose.msra.mxu1 %v650_v4 }
  0x3b   : > { %716 = vmatpush.bf16.xpose.msra.mxu2 %v650_v4  ;;  %717 = vmatpush.bf16.xpose.msra.mxu3 %v650_v4 }
  0x42   : > { %314 = vmatpush.bf16.xpose.msra.mxu0 %v649_v5  ;;  %718 = vmatpush.bf16.xpose.msra.mxu1 %v649_v5 }
  0x43   : > { %719 = vmatpush.bf16.xpose.msra.mxu2 %v649_v5  ;;  %720 = vmatpush.bf16.xpose.msra.mxu3 %v649_v5 }
  0x4a   : > { %315 = vmatpush.bf16.xpose.msra.mxu0 %v648_v6  ;;  %721 = vmatpush.bf16.xpose.msra.mxu1 %v648_v6 }
  0x4b   : > { %722 = vmatpush.bf16.xpose.msra.mxu2 %v648_v6  ;;  %723 = vmatpush.bf16.xpose.msra.mxu3 %v648_v6 }
  0x52   : > { %316 = vmatpush.bf16.xpose.msra.mxu0 %v647_v7  ;;  %724 = vmatpush.bf16.xpose.msra.mxu1 %v647_v7 }
  0x53   : > { %725 = vmatpush.bf16.xpose.msra.mxu2 %v647_v7  ;;  %726 = vmatpush.bf16.xpose.msra.mxu3 %v647_v7 }
  0x59   : > { %317 = vmatmul.bf16.vlgmr.msra.gmra.mxu0 %v639_v8  ;;  %327 = vmatmul.bf16.vlgmr.msra.gmra.mxu1 %v641_v9 }
  0x5a   : > { %337 = vmatmul.bf16.vlgmr.msra.gmra.mxu2 %v643_v10  ;;  %347 = vmatmul.bf16.vlgmr.msra.gmra.mxu3 %v645_v11 }
  0x69   : > { %322 = vmatmul.bf16.gmra.mxu0 %v640_v12  ;;  %332 = vmatmul.bf16.gmra.mxu1 %v642_v13 }
  0x6a   : > { %342 = vmatmul.bf16.gmra.mxu2 %v644_v14  ;;  %352 = vmatmul.bf16.gmra.mxu3 %v646_v15 }
  0xd6   : > { %v318_v16 = vpop.f32.mrf.mxu0  ;;  %v328_v17 = vpop.f32.mrf.mxu1 }
  0xd7   : > { %v358_v18 = vmul.f32 0.5, %v318_v16  ;;  %v362_v19 = vmul.f32 0.5, %v328_v17 }
  0xd9   : > { %801 = vtanh.f32 %v358_v18 }
  0xda   : > { %803 = vtanh.f32 %v362_v19 }
  0xdd   : > { %v338_v20 = vpop.f32.mrf.mxu2  ;;  %v348_v21 = vpop.f32.mrf.mxu3 }
  0xde   : > { %v320_v22 = vpop.f32.mrf.mxu0  ;;  %v330_v23 = vpop.f32.mrf.mxu1  ;;  %v366_v26 = vmul.f32 0.5, %v338_v20  ;;  %v370_v27 = vmul.f32 0.5, %v348_v21 }
  0xdf   : > { %v359_v24 = vmul.f32 0.5, %v320_v22  ;;  %v363_v25 = vmul.f32 0.5, %v330_v23  ;;  %v802_v28 = vpop.eup %801 }
  0xe0   : > { %v804_v29 = vpop.eup %803  ;;  %v390_v36 = vmul.f32 0.5, %v802_v28 }
  0xe1   : > { %805 = vtanh.f32 %v359_v24  ;;  %v394_v38 = vmul.f32 0.5, %v804_v29 }
  0xe2   : > { %807 = vtanh.f32 %v363_v25  ;;  %v406_v45 = vadd.f32 0.5, %v390_v36 }
  0xe3   : > { %809 = vtanh.f32 %v366_v26  ;;  %v410_v48 = vadd.f32 0.5, %v394_v38 }
  0xe4   : > { %811 = vtanh.f32 %v370_v27 }
  0xe5   : > { %v340_v30 = vpop.f32.mrf.mxu2  ;;  %v350_v31 = vpop.f32.mrf.mxu3 }
  0xe6   : > { %v367_v32 = vmul.f32 0.5, %v340_v30  ;;  %v371_v33 = vmul.f32 0.5, %v350_v31  ;;  %v323_v34 = vpop.f32.mrf.mxu0  ;;  %v333_v35 = vpop.f32.mrf.mxu1 }
  0xe7   : > { %v806_v37 = vpop.eup %805  ;;  %v360_v43 = vmul.f32 0.5, %v323_v34  ;;  %v364_v47 = vmul.f32 0.5, %v333_v35 }
  0xe8   : > { %813 = vtanh.f32 %v367_v32  ;;  %v808_v39 = vpop.eup %807  ;;  %v391_v40 = vmul.f32 0.5, %v806_v37 }
  0xe9   : > { %815 = vtanh.f32 %v371_v33  ;;  %v810_v41 = vpop.eup %809  ;;  %v395_v42 = vmul.f32 0.5, %v808_v39 }
  0xea   : > { %v812_v44 = vpop.eup %811  ;;  %v407_v46 = vadd.f32 0.5, %v391_v40  ;;  %v398_v50 = vmul.f32 0.5, %v810_v41  ;;  %817 = vtanh.f32 %v360_v43 }
  0xeb   : > { %v411_v49 = vadd.f32 0.5, %v395_v42  ;;  %v402_v55 = vmul.f32 0.5, %v812_v44  ;;  %819 = vtanh.f32 %v364_v47 }
  0xec   : > { %v659_v51 = vpack.c.bf16 %v407_v46, %v406_v45  ;;  %v414_v1 = vadd.f32 0.5, %v398_v50 }
  0xed   : > { %v343_v52 = vpop.f32.mrf.mxu2  ;;  %v353_v53 = vpop.f32.mrf.mxu3  ;;  %v669_v56 = vpack.c.bf16 %v411_v49, %v410_v48  ;;  %v418_v4 = vadd.f32 0.5, %v402_v55 }
  0xee   : > { %v814_v54 = vpop.eup %813  ;;  %v325_v57 = vpop.f32.mrf.mxu0  ;;  %660 = vst [vmem:[%s1039_s24] sm:$0xff] %v659_v51   ;;  %v368_v0 = vmul.f32 0.5, %v343_v52  ;;  %v372_v3 = vmul.f32 0.5, %v353_v53 }
  0xef   : > { %v335_v58 = vpop.f32.mrf.mxu1  ;;  %v816_v59 = vpop.eup %815  ;;  %v399_v60 = vmul.f32 0.5, %v814_v54  ;;  %v361_v61 = vmul.f32 0.5, %v325_v57  ;;  %697 = vst [vmem:[%s1039_s24 + $0x10] sm:$0xff] %v669_v56  }
  0xf0   : > { %v365_v62 = vmul.f32 0.5, %v335_v58  ;;  %v403_v63 = vmul.f32 0.5, %v816_v59  ;;  %v818_v7 = vpop.eup %817 }
  0xf1   : > { %v415_v2 = vadd.f32 0.5, %v399_v60  ;;  %821 = vtanh.f32 %v361_v61  ;;  %v820_v9 = vpop.eup %819  ;;  %v392_v14 = vmul.f32 0.5, %v818_v7 }
  0xf2   : > { %v419_v5 = vadd.f32 0.5, %v403_v63  ;;  %823 = vtanh.f32 %v365_v62  ;;  %v396_v16 = vmul.f32 0.5, %v820_v9 }
  0xf3   : > { %v679_v6 = vpack.c.bf16 %v415_v2, %v414_v1  ;;  %825 = vtanh.f32 %v368_v0  ;;  %v408_v22 = vadd.f32 0.5, %v392_v14 }
  0xf4   : > { %v689_v8 = vpack.c.bf16 %v419_v5, %v418_v4  ;;  %827 = vtanh.f32 %v372_v3  ;;  %v412_v24 = vadd.f32 0.5, %v396_v16 }
  0xf5   : > { %699 = vst [vmem:[%s1039_s24 + $0x20] sm:$0xff] %v679_v6   ;;  %v345_v10 = vpop.f32.mrf.mxu2  ;;  %v355_v11 = vpop.f32.mrf.mxu3 }
  0xf6   : > { %701 = vst [vmem:[%s1039_s24 + $0x30] sm:$0xff] %v689_v8   ;;  %v369_v12 = vmul.f32 0.5, %v345_v10  ;;  %v373_v13 = vmul.f32 0.5, %v355_v11 }
  0xf7   : > { %v822_v15 = vpop.eup %821 }
  0xf8   : > { %829 = vtanh.f32 %v369_v12  ;;  %v824_v17 = vpop.eup %823  ;;  %v393_v18 = vmul.f32 0.5, %v822_v15 }
  0xf9   : > { %831 = vtanh.f32 %v373_v13  ;;  %v826_v19 = vpop.eup %825  ;;  %v397_v20 = vmul.f32 0.5, %v824_v17 }
  0xfa   : > { %v828_v21 = vpop.eup %827  ;;  %v409_v23 = vadd.f32 0.5, %v393_v18  ;;  %v400_v26 = vmul.f32 0.5, %v826_v19 }
  0xfb   : > { %v413_v25 = vadd.f32 0.5, %v397_v20  ;;  %v404_v29 = vmul.f32 0.5, %v828_v21 }
  0xfc   : > { %v664_v27 = vpack.c.bf16 %v409_v23, %v408_v22  ;;  %v416_v34 = vadd.f32 0.5, %v400_v26 }
  0xfd   : > { %v674_v30 = vpack.c.bf16 %v413_v25, %v412_v24  ;;  %v420_v36 = vadd.f32 0.5, %v404_v29 }
  0xfe   : > { %v830_v28 = vpop.eup %829  ;;  %696 = vst [vmem:[%s1039_s24 + $0x8] sm:$0xff] %v664_v27  }
  0xff   : > { %v832_v31 = vpop.eup %831  ;;  %v401_v32 = vmul.f32 0.5, %v830_v28  ;;  %698 = vst [vmem:[%s1039_s24 + $0x18] sm:$0xff] %v674_v30  }
 0x100   : > { %v405_v33 = vmul.f32 0.5, %v832_v31 }
 0x101   : > { %v417_v35 = vadd.f32 0.5, %v401_v32 }
 0x102   : > { %v421_v37 = vadd.f32 0.5, %v405_v33 }
 0x103   : > { %v684_v38 = vpack.c.bf16 %v417_v35, %v416_v34 }
 0x104   : > { %v694_v39 = vpack.c.bf16 %v421_v37, %v420_v36 }
 0x105   : > { %700 = vst [vmem:[%s1039_s24 + $0x28] sm:$0xff] %v684_v38  }
 0x106   : > { %702 = vst [vmem:[%s1039_s24 + $0x38] sm:$0xff] %v694_v39  }
 0x107   : > { %860 = shalt.err (!%p857_p7)
}
 0x108   : > { %s929_s18 = smov 64   ;;  %s930_s24 = smov 128  }
 0x109   : > { %s931_s26 = smov 4  }
 0x10a   : > { %727 = dma.vmem_to_hbm [thread:$0]  (%p998_p3), %s470_s30, 1024, %s472_s3, %s455_s4, %s929_s18, %s930_s24, %s931_s26  }
 0x10b PF: > { %p733_p9 = scmp.ge.s32.totalorder %s927_s16, 2  ;;  %s486_s13 = sand.u32 1, %s899_s9  }
 0x10c   : > { %s487_s12 = scalar_lea.sflag [#allocation3], %s486_s13 }
 0x10d   : > { %p730_p10 = pnand %p733_p9, %p1007_p8 }
 0x10f   : > { %p731_p11 = pneg %p730_p10 }
 0x111   : > { %894 = dma.done.wait (%p731_p11), %s487_s12, 1024  }
 0x112   : > { %896 = vsyncadd (%p731_p11), %s487_s12, 4294966272  ;;  %s15_s16 = sadd.s32 1, %s927_s16   ;;  %s1100_s9 = smov %s903_s10 }
 0x113   : > { %p12_p12 = scmp.ge.s32.totalorder %s15_s16, 6   ;;  %s1101_s10 = smov %s907_s11 }
 0x114   : > { %s1102_s11 = smov %s1016_s27  ;;  %s1103_s12 = smov %s919_s14 }
 0x115   : > { %s1104_s13 = smov %s923_s15  ;;  %s1105_s14 = smov %s1108_s19 }
 0x116   : > { %s1106_s15 = smov %s1112_s20  ;;  %14 = sbr.rel (!%p12_p12) target bundleno = 5 (0x5), region = 66 }
 0x11b   :  { %493 = vsyncpa [#allocation3], 1 }
 0x11c   :  { %495 = vsyncpa [#allocation3 + $0x1], 1 }

</bundles_post_ra>
